<compile_context>
chip_gen: v6e
topology: v6e:2x2x1
jax: 0.10.0
libtpu: 0.0.40
codegen_flags: <defaults>
</compile_context>

<pallas_src>
import jax
import jax.numpy as jnp
from jax.experimental import pallas as pl
from jax.experimental.pallas import tpu as pltpu


# ----------------------------------------------------------------------------
# Fused kernel: hoisted layer-0 projection + wavefront ReLU recurrence + head
# ----------------------------------------------------------------------------
def _make_fused_rnn_kernel(num_layers, T, B):
    """Ref order: x2d, (w_ih_t, w_hh_t, b) * num_layers, w_out_t, b_out,
    o_ref, seq_scratch."""

    def kernel(*refs):
        x_ref = refs[0]
        layer_refs = refs[1:1 + 3 * num_layers]
        wout_ref = refs[1 + 3 * num_layers]
        bout_ref = refs[2 + 3 * num_layers]
        o_ref = refs[3 + 3 * num_layers]
        seq = refs[4 + 3 * num_layers]            # VMEM scratch (T*B, H) f32

        # Load all weights/biases once; they stay resident in vregs.
        wih = [layer_refs[3 * l][...] for l in range(num_layers)]      # (in, H)
        whh = [layer_refs[3 * l + 1][...] for l in range(num_layers)]  # (H, H)
        bias = [layer_refs[3 * l + 2][...] for l in range(num_layers)] # (1, H)

        def mxu(act, w):
            # MXU-native operands (bf16 in the perf config), f32 accumulation.
            return jnp.dot(act.astype(w.dtype), w,
                           preferred_element_type=jnp.float32)

        # Hoisted layer-0 input projection for all T timesteps (one bulk MXU
        # push, off the per-step critical path).  The eval-mode BN1->noise->BN2
        # affine is already folded into wih[0]/bias[0] by the wrapper.
        seq[...] = mxu(x_ref[...], wih[0]) + bias[0]

        # Wavefront recurrence: in wave w, layer l processes timestep t = w - l.
        # All layer-steps of one wave only depend on wave w-1, so their matmuls
        # are independent and can be in flight simultaneously.  Layers are
        # visited in DESCENDING order so h[l-1] still holds timestep t when
        # layer l reads it.
        h = [None] * num_layers                   # h[l] carry: h_{l, w-l}, f32
        for w in range(T + num_layers - 1):
            for l in range(num_layers - 1, -1, -1):
                t = w - l
                if t < 0 or t >= T:
                    continue
                if l == 0:
                    # Static, sublane-aligned (B, H) slice of the projection.
                    xp = seq[t * B:(t + 1) * B, :]
                else:
                    xp = mxu(h[l - 1], wih[l]) + bias[l]
                if t == 0:
                    pre = xp                      # peeled: h_{l,-1} == 0
                else:
                    pre = xp + mxu(h[l], whh[l])
                h[l] = jnp.maximum(pre, 0.0)      # f32 ReLU/add (VPU)

        # Output head on the final hidden state of the last layer (fused; only
        # the (B, O) result ever goes back to HBM).
        y = mxu(h[num_layers - 1], wout_ref[...]) + bout_ref[...]
        o_ref[...] = y.astype(o_ref.dtype)

    return kernel


def simple_rnn_forward(kparams, x_btf):
    """x_btf: (B, T, F) batch-first, like nn.RNN(batch_first=True)."""
    B0, T, F = x_btf.shape

    # Pad batch to a multiple of 8 so every per-timestep row block is
    # sublane-aligned (perf only; padded rows are dropped afterwards).
    pad = (-B0) % 8
    if pad:
        x_btf = jnp.concatenate(
            [x_btf, jnp.zeros((pad, T, F), x_btf.dtype)], axis=0)
    B = B0 + pad

    layers = kparams["rnn"]
    num_layers = len(layers)
    H = layers[0]["w_hh_t"].shape[0]
    O = kparams["w_out_t"].shape[1]

    # Tiny time-major (T*B, F) slab; keeps every in-kernel access a plain
    # contiguous 2-D slice (timestep t == rows [t*B, (t+1)*B)).
    x2d = jnp.transpose(x_btf, (1, 0, 2)).reshape(T * B, F)

    flat_args = [x2d]
    in_specs = [pl.BlockSpec((T * B, F), lambda i: (0, 0))]
    for lp in layers:
        flat_args += [lp["w_ih_t"], lp["w_hh_t"], lp["b"]]
        in_specs += [
            pl.BlockSpec(lp["w_ih_t"].shape, lambda i: (0, 0)),
            pl.BlockSpec(lp["w_hh_t"].shape, lambda i: (0, 0)),
            pl.BlockSpec(lp["b"].shape, lambda i: (0, 0)),
        ]
    flat_args += [kparams["w_out_t"], kparams["b_out"]]
    in_specs += [
        pl.BlockSpec((H, O), lambda i: (0, 0)),
        pl.BlockSpec((1, O), lambda i: (0, 0)),
    ]

    kernel = _make_fused_rnn_kernel(num_layers, T, B)
    out = pl.pallas_call(
        kernel,
        out_shape=jax.ShapeDtypeStruct((B, O), x_btf.dtype),
        grid=(1,),
        in_specs=in_specs,
        out_specs=pl.BlockSpec((B, O), lambda i: (0, 0)),
        scratch_shapes=[pltpu.VMEM((T * B, H), jnp.float32)],
    )(*flat_args)
    return out[:B0] if pad else out


# ----------------------------------------------------------------------------
# Parameters: raw (PyTorch-like) params + folding into kernel params
# ----------------------------------------------------------------------------
def init_raw_params(key, input_size, hidden_dim, output_size, num_layers):
    keys = jax.random.split(key, 8 + 4 * num_layers + 2)
    ki = iter(range(len(keys)))
    raw = {}

    def bn_params():
        return {
            "gamma": 1.0 + 0.1 * jax.random.normal(keys[next(ki)], (input_size,), jnp.float32),
            "beta": 0.1 * jax.random.normal(keys[next(ki)], (input_size,), jnp.float32),
            "mean": 0.1 * jax.random.normal(keys[next(ki)], (input_size,), jnp.float32),
            "var": jax.random.uniform(keys[next(ki)], (input_size,), jnp.float32, 0.5, 1.5),
        }

    raw["bn1"] = bn_params()
    raw["bn2"] = bn_params()

    k = 1.0 / jnp.sqrt(jnp.float32(hidden_dim))
    rnn = []
    for layer in range(num_layers):
        in_dim = input_size if layer == 0 else hidden_dim
        rnn.append({
            "w_ih": jax.random.uniform(keys[next(ki)], (hidden_dim, in_dim), jnp.float32, -k, k),
            "w_hh": jax.random.uniform(keys[next(ki)], (hidden_dim, hidden_dim), jnp.float32, -k, k),
            "b_ih": jax.random.uniform(keys[next(ki)], (hidden_dim,), jnp.float32, -k, k),
            "b_hh": jax.random.uniform(keys[next(ki)], (hidden_dim,), jnp.float32, -k, k),
        })
    raw["rnn"] = rnn
    raw["w_out"] = jax.random.uniform(keys[next(ki)], (output_size, hidden_dim), jnp.float32, -k, k)
    raw["b_out"] = jax.random.uniform(keys[next(ki)], (output_size,), jnp.float32, -k, k)
    return raw


def prepare_kernel_params(raw, eps=1e-5, mxu_dtype=jnp.bfloat16):
    """Fold eval-mode BN1 -> noise(identity) -> BN2 into layer-0 RNN weights.

    Matmul operands (weights) are stored in `mxu_dtype` (bf16 = native MXU
    input on v5e/v6e/v7x); biases stay f32 and all accumulation is f32.
    """
    s1 = raw["bn1"]["gamma"] / jnp.sqrt(raw["bn1"]["var"] + eps)
    t1 = raw["bn1"]["beta"] - raw["bn1"]["mean"] * s1
    s2 = raw["bn2"]["gamma"] / jnp.sqrt(raw["bn2"]["var"] + eps)
    t2 = raw["bn2"]["beta"] - raw["bn2"]["mean"] * s2
    scale = s2 * s1                       # fused per-feature affine
    shift = s2 * t1 + t2

    layers = []
    for i, lp in enumerate(raw["rnn"]):
        w_ih_t = lp["w_ih"].T             # (in_dim, H)
        b = (lp["b_ih"] + lp["b_hh"]).reshape(1, -1)
        if i == 0:
            b = b + (shift[None, :] @ w_ih_t)          # shift @ W_ih^T
            w_ih_t = scale[:, None] * w_ih_t           # diag(scale) @ W_ih^T
        layers.append({
            "w_ih_t": w_ih_t.astype(mxu_dtype),
            "w_hh_t": lp["w_hh"].T.astype(mxu_dtype),
            "b": b.astype(jnp.float32),
        })

    return {
        "rnn": layers,
        "w_out_t": raw["w_out"].T.astype(mxu_dtype),   # (H, O)
        "b_out": raw["b_out"].reshape(1, -1).astype(jnp.float32),   # (1, O)
    }


# ----------------------------------------------------------------------------
# Pure-JAX reference (explicit BN, per-step recurrence) for correctness check
# ----------------------------------------------------------------------------
def simple_rnn_reference(raw, x_btf, eps=1e-5):
    def bn(v, p):
        return (v - p["mean"]) / jnp.sqrt(p["var"] + eps) * p["gamma"] + p["beta"]

    h = bn(x_btf, raw["bn1"])
    h = bn(h, raw["bn2"])                 # GaussianNoise std=0 -> identity
    h = jnp.transpose(h, (1, 0, 2))       # (T, B, F)
    for lp in raw["rnn"]:
        B = h.shape[1]
        H = lp["w_hh"].shape[0]
        hid = jnp.zeros((B, H), jnp.float32)
        outs = []
        for t in range(h.shape[0]):
            hid = jnp.maximum(
                h[t] @ lp["w_ih"].T + lp["b_ih"] + hid @ lp["w_hh"].T + lp["b_hh"],
                0.0)
            outs.append(hid)
        h = jnp.stack(outs, axis=0)
    return h[-1] @ raw["w_out"].T + raw["b_out"][None, :]


if __name__ == "__main__":
    B, T = 8, 8
    input_size, hidden_dim, output_size, num_layers = 16, 32, 8, 2

    key = jax.random.PRNGKey(0)
    k_param, k_x = jax.random.split(key)
    raw = init_raw_params(k_param, input_size, hidden_dim, output_size, num_layers)
    x = jax.random.normal(k_x, (B, T, input_size), jnp.float32)
    ref = simple_rnn_reference(raw, x)

    # 1) Exact-precision path (f32 MXU operands): strict check vs reference.
    out_f32 = simple_rnn_forward(prepare_kernel_params(raw, mxu_dtype=jnp.float32), x)
    out_f32 = jax.block_until_ready(out_f32)
    assert out_f32.shape == (B, output_size)
    assert jnp.allclose(out_f32, ref, atol=1e-4, rtol=1e-4), "f32 mismatch vs reference"

    # 2) Perf config: bf16 MXU operands (native MXU input dtype), f32 accumulate.
    #    Looser tolerance reflects bf16 operand quantization only.
    out_bf16 = simple_rnn_forward(prepare_kernel_params(raw, mxu_dtype=jnp.bfloat16), x)
    out_bf16 = jax.block_until_ready(out_bf16)
    assert out_bf16.shape == (B, output_size)
    assert jnp.allclose(out_bf16, ref, atol=5e-2, rtol=5e-2), "bf16 mismatch vs reference"

    print("KERNEL_OK")
</pallas_src>

<mosaic_0001>
module attributes {stable_mosaic.version = 11 : i64} {
  func.func @kernel(%arg0: i32, %arg1: memref<64x16xf32, #tpu.memory_space<vmem>>, %arg2: memref<16x32xf32, #tpu.memory_space<vmem>>, %arg3: memref<32x32xf32, #tpu.memory_space<vmem>>, %arg4: memref<1x32xf32, #tpu.memory_space<vmem>>, %arg5: memref<32x32xf32, #tpu.memory_space<vmem>>, %arg6: memref<32x32xf32, #tpu.memory_space<vmem>>, %arg7: memref<1x32xf32, #tpu.memory_space<vmem>>, %arg8: memref<32x8xf32, #tpu.memory_space<vmem>>, %arg9: memref<1x8xf32, #tpu.memory_space<vmem>>, %arg10: memref<8x8xf32, #tpu.memory_space<vmem>>, %arg11: memref<64x32xf32, #tpu.memory_space<vmem>>) attributes {dimension_semantics = [#tpu.dimension_semantics<arbitrary>], iteration_bounds = array<i64: 1>, scalar_prefetch = 0 : i64, scratch_operands = 1 : i64, tpu.core_type = #tpu.core_type<tc>, window_params = [{pipeline_mode = #tpu.pipeline_mode<synchronous>, transform_indices = @transform_0, window_bounds = array<i64: 64, 16>}, {pipeline_mode = #tpu.pipeline_mode<synchronous>, transform_indices = @transform_1, window_bounds = array<i64: 16, 32>}, {pipeline_mode = #tpu.pipeline_mode<synchronous>, transform_indices = @transform_2, window_bounds = array<i64: 32, 32>}, {pipeline_mode = #tpu.pipeline_mode<synchronous>, transform_indices = @transform_3, window_bounds = array<i64: 1, 32>}, {pipeline_mode = #tpu.pipeline_mode<synchronous>, transform_indices = @transform_4, window_bounds = array<i64: 32, 32>}, {pipeline_mode = #tpu.pipeline_mode<synchronous>, transform_indices = @transform_5, window_bounds = array<i64: 32, 32>}, {pipeline_mode = #tpu.pipeline_mode<synchronous>, transform_indices = @transform_6, window_bounds = array<i64: 1, 32>}, {pipeline_mode = #tpu.pipeline_mode<synchronous>, transform_indices = @transform_7, window_bounds = array<i64: 32, 8>}, {pipeline_mode = #tpu.pipeline_mode<synchronous>, transform_indices = @transform_8, window_bounds = array<i64: 1, 8>}, {pipeline_mode = #tpu.pipeline_mode<synchronous>, transform_indices = @transform_9, window_bounds = array<i64: 8, 8>}]} {
    %c0 = arith.constant 0 : index
    %c0_0 = arith.constant 0 : index
    %0 = vector.load %arg2[%c0, %c0_0] : memref<16x32xf32, #tpu.memory_space<vmem>>, vector<16x32xf32>
    %c0_1 = arith.constant 0 : index
    %c0_2 = arith.constant 0 : index
    %1 = vector.load %arg5[%c0_1, %c0_2] : memref<32x32xf32, #tpu.memory_space<vmem>>, vector<32x32xf32>
    %c0_3 = arith.constant 0 : index
    %c0_4 = arith.constant 0 : index
    %2 = vector.load %arg3[%c0_3, %c0_4] : memref<32x32xf32, #tpu.memory_space<vmem>>, vector<32x32xf32>
    %c0_5 = arith.constant 0 : index
    %c0_6 = arith.constant 0 : index
    %3 = vector.load %arg6[%c0_5, %c0_6] : memref<32x32xf32, #tpu.memory_space<vmem>>, vector<32x32xf32>
    %c0_7 = arith.constant 0 : index
    %c0_8 = arith.constant 0 : index
    %4 = vector.load %arg4[%c0_7, %c0_8] : memref<1x32xf32, #tpu.memory_space<vmem>>, vector<1x32xf32>
    %c0_9 = arith.constant 0 : index
    %c0_10 = arith.constant 0 : index
    %5 = vector.load %arg7[%c0_9, %c0_10] : memref<1x32xf32, #tpu.memory_space<vmem>>, vector<1x32xf32>
    %c0_11 = arith.constant 0 : index
    %c0_12 = arith.constant 0 : index
    %6 = vector.load %arg1[%c0_11, %c0_12] : memref<64x16xf32, #tpu.memory_space<vmem>>, vector<64x16xf32>
    %cst = arith.constant dense<0.000000e+00> : vector<64x32xf32>
    %7 = tpu.matmul %6, %0, %cst {dimension_numbers = #tpu.dot_dimension_numbers<[1], [0], [0], [1], [0, 0, 1, 1], [], []>} : vector<64x16xf32>, vector<16x32xf32>, vector<64x32xf32> -> vector<64x32xf32>
    %8 = vector.broadcast %4 : vector<1x32xf32> to vector<64x32xf32>
    %9 = arith.addf %7, %8 : vector<64x32xf32>
    %c0_13 = arith.constant 0 : index
    %c0_14 = arith.constant 0 : index
    %10 = vector.load %arg11[%c0_13, %c0_14] : memref<64x32xf32, #tpu.memory_space<vmem>>, vector<64x32xf32>
    tpu.vector_store %arg11[%c0_13, %c0_14], %9 {strides = array<i32>} : memref<64x32xf32, #tpu.memory_space<vmem>>, vector<64x32xf32>,
    %c0_15 = arith.constant 0 : index
    %c0_16 = arith.constant 0 : index
    %11 = vector.load %arg11[%c0_15, %c0_16] : memref<64x32xf32, #tpu.memory_space<vmem>>, vector<8x32xf32>
    %cst_17 = arith.constant 0.000000e+00 : f32
    %12 = vector.broadcast %cst_17 : f32 to vector<8x32xf32>
    %13 = arith.maximumf %11, %12 : vector<8x32xf32>
    %cst_18 = arith.constant dense<0.000000e+00> : vector<8x32xf32>
    %14 = tpu.matmul %13, %1, %cst_18 {dimension_numbers = #tpu.dot_dimension_numbers<[1], [0], [0], [1], [0, 0, 1, 1], [], []>} : vector<8x32xf32>, vector<32x32xf32>, vector<8x32xf32> -> vector<8x32xf32>
    %15 = vector.broadcast %5 : vector<1x32xf32> to vector<8x32xf32>
    %16 = arith.addf %14, %15 : vector<8x32xf32>
    %cst_19 = arith.constant 0.000000e+00 : f32
    %17 = vector.broadcast %cst_19 : f32 to vector<8x32xf32>
    %18 = arith.maximumf %16, %17 : vector<8x32xf32>
    %c8 = arith.constant 8 : index
    %c0_20 = arith.constant 0 : index
    %19 = vector.load %arg11[%c8, %c0_20] : memref<64x32xf32, #tpu.memory_space<vmem>>, vector<8x32xf32>
    %cst_21 = arith.constant dense<0.000000e+00> : vector<8x32xf32>
    %20 = tpu.matmul %13, %2, %cst_21 {dimension_numbers = #tpu.dot_dimension_numbers<[1], [0], [0], [1], [0, 0, 1, 1], [], []>} : vector<8x32xf32>, vector<32x32xf32>, vector<8x32xf32> -> vector<8x32xf32>
    %21 = arith.addf %19, %20 : vector<8x32xf32>
    %cst_22 = arith.constant 0.000000e+00 : f32
    %22 = vector.broadcast %cst_22 : f32 to vector<8x32xf32>
    %23 = arith.maximumf %21, %22 : vector<8x32xf32>
    %cst_23 = arith.constant dense<0.000000e+00> : vector<8x32xf32>
    %24 = tpu.matmul %23, %1, %cst_23 {dimension_numbers = #tpu.dot_dimension_numbers<[1], [0], [0], [1], [0, 0, 1, 1], [], []>} : vector<8x32xf32>, vector<32x32xf32>, vector<8x32xf32> -> vector<8x32xf32>
    %25 = vector.broadcast %5 : vector<1x32xf32> to vector<8x32xf32>
    %26 = arith.addf %24, %25 : vector<8x32xf32>
    %cst_24 = arith.constant dense<0.000000e+00> : vector<8x32xf32>
    %27 = tpu.matmul %18, %3, %cst_24 {dimension_numbers = #tpu.dot_dimension_numbers<[1], [0], [0], [1], [0, 0, 1, 1], [], []>} : vector<8x32xf32>, vector<32x32xf32>, vector<8x32xf32> -> vector<8x32xf32>
    %28 = arith.addf %26, %27 : vector<8x32xf32>
    %cst_25 = arith.constant 0.000000e+00 : f32
    %29 = vector.broadcast %cst_25 : f32 to vector<8x32xf32>
    %30 = arith.maximumf %28, %29 : vector<8x32xf32>
    %c16 = arith.constant 16 : index
    %c0_26 = arith.constant 0 : index
    %31 = vector.load %arg11[%c16, %c0_26] : memref<64x32xf32, #tpu.memory_space<vmem>>, vector<8x32xf32>
    %cst_27 = arith.constant dense<0.000000e+00> : vector<8x32xf32>
    %32 = tpu.matmul %23, %2, %cst_27 {dimension_numbers = #tpu.dot_dimension_numbers<[1], [0], [0], [1], [0, 0, 1, 1], [], []>} : vector<8x32xf32>, vector<32x32xf32>, vector<8x32xf32> -> vector<8x32xf32>
    %33 = arith.addf %31, %32 : vector<8x32xf32>
    %cst_28 = arith.constant 0.000000e+00 : f32
    %34 = vector.broadcast %cst_28 : f32 to vector<8x32xf32>
    %35 = arith.maximumf %33, %34 : vector<8x32xf32>
    %cst_29 = arith.constant dense<0.000000e+00> : vector<8x32xf32>
    %36 = tpu.matmul %35, %1, %cst_29 {dimension_numbers = #tpu.dot_dimension_numbers<[1], [0], [0], [1], [0, 0, 1, 1], [], []>} : vector<8x32xf32>, vector<32x32xf32>, vector<8x32xf32> -> vector<8x32xf32>
    %37 = vector.broadcast %5 : vector<1x32xf32> to vector<8x32xf32>
    %38 = arith.addf %36, %37 : vector<8x32xf32>
    %cst_30 = arith.constant dense<0.000000e+00> : vector<8x32xf32>
    %39 = tpu.matmul %30, %3, %cst_30 {dimension_numbers = #tpu.dot_dimension_numbers<[1], [0], [0], [1], [0, 0, 1, 1], [], []>} : vector<8x32xf32>, vector<32x32xf32>, vector<8x32xf32> -> vector<8x32xf32>
    %40 = arith.addf %38, %39 : vector<8x32xf32>
    %cst_31 = arith.constant 0.000000e+00 : f32
    %41 = vector.broadcast %cst_31 : f32 to vector<8x32xf32>
    %42 = arith.maximumf %40, %41 : vector<8x32xf32>
    %c24 = arith.constant 24 : index
    %c0_32 = arith.constant 0 : index
    %43 = vector.load %arg11[%c24, %c0_32] : memref<64x32xf32, #tpu.memory_space<vmem>>, vector<8x32xf32>
    %cst_33 = arith.constant dense<0.000000e+00> : vector<8x32xf32>
    %44 = tpu.matmul %35, %2, %cst_33 {dimension_numbers = #tpu.dot_dimension_numbers<[1], [0], [0], [1], [0, 0, 1, 1], [], []>} : vector<8x32xf32>, vector<32x32xf32>, vector<8x32xf32> -> vector<8x32xf32>
    %45 = arith.addf %43, %44 : vector<8x32xf32>
    %cst_34 = arith.constant 0.000000e+00 : f32
    %46 = vector.broadcast %cst_34 : f32 to vector<8x32xf32>
    %47 = arith.maximumf %45, %46 : vector<8x32xf32>
    %cst_35 = arith.constant dense<0.000000e+00> : vector<8x32xf32>
    %48 = tpu.matmul %47, %1, %cst_35 {dimension_numbers = #tpu.dot_dimension_numbers<[1], [0], [0], [1], [0, 0, 1, 1], [], []>} : vector<8x32xf32>, vector<32x32xf32>, vector<8x32xf32> -> vector<8x32xf32>
    %49 = vector.broadcast %5 : vector<1x32xf32> to vector<8x32xf32>
    %50 = arith.addf %48, %49 : vector<8x32xf32>
    %cst_36 = arith.constant dense<0.000000e+00> : vector<8x32xf32>
    %51 = tpu.matmul %42, %3, %cst_36 {dimension_numbers = #tpu.dot_dimension_numbers<[1], [0], [0], [1], [0, 0, 1, 1], [], []>} : vector<8x32xf32>, vector<32x32xf32>, vector<8x32xf32> -> vector<8x32xf32>
    %52 = arith.addf %50, %51 : vector<8x32xf32>
    %cst_37 = arith.constant 0.000000e+00 : f32
    %53 = vector.broadcast %cst_37 : f32 to vector<8x32xf32>
    %54 = arith.maximumf %52, %53 : vector<8x32xf32>
    %c32 = arith.constant 32 : index
    %c0_38 = arith.constant 0 : index
    %55 = vector.load %arg11[%c32, %c0_38] : memref<64x32xf32, #tpu.memory_space<vmem>>, vector<8x32xf32>
    %cst_39 = arith.constant dense<0.000000e+00> : vector<8x32xf32>
    %56 = tpu.matmul %47, %2, %cst_39 {dimension_numbers = #tpu.dot_dimension_numbers<[1], [0], [0], [1], [0, 0, 1, 1], [], []>} : vector<8x32xf32>, vector<32x32xf32>, vector<8x32xf32> -> vector<8x32xf32>
    %57 = arith.addf %55, %56 : vector<8x32xf32>
    %cst_40 = arith.constant 0.000000e+00 : f32
    %58 = vector.broadcast %cst_40 : f32 to vector<8x32xf32>
    %59 = arith.maximumf %57, %58 : vector<8x32xf32>
    %cst_41 = arith.constant dense<0.000000e+00> : vector<8x32xf32>
    %60 = tpu.matmul %59, %1, %cst_41 {dimension_numbers = #tpu.dot_dimension_numbers<[1], [0], [0], [1], [0, 0, 1, 1], [], []>} : vector<8x32xf32>, vector<32x32xf32>, vector<8x32xf32> -> vector<8x32xf32>
    %61 = vector.broadcast %5 : vector<1x32xf32> to vector<8x32xf32>
    %62 = arith.addf %60, %61 : vector<8x32xf32>
    %cst_42 = arith.constant dense<0.000000e+00> : vector<8x32xf32>
    %63 = tpu.matmul %54, %3, %cst_42 {dimension_numbers = #tpu.dot_dimension_numbers<[1], [0], [0], [1], [0, 0, 1, 1], [], []>} : vector<8x32xf32>, vector<32x32xf32>, vector<8x32xf32> -> vector<8x32xf32>
    %64 = arith.addf %62, %63 : vector<8x32xf32>
    %cst_43 = arith.constant 0.000000e+00 : f32
    %65 = vector.broadcast %cst_43 : f32 to vector<8x32xf32>
    %66 = arith.maximumf %64, %65 : vector<8x32xf32>
    %c40 = arith.constant 40 : index
    %c0_44 = arith.constant 0 : index
    %67 = vector.load %arg11[%c40, %c0_44] : memref<64x32xf32, #tpu.memory_space<vmem>>, vector<8x32xf32>
    %cst_45 = arith.constant dense<0.000000e+00> : vector<8x32xf32>
    %68 = tpu.matmul %59, %2, %cst_45 {dimension_numbers = #tpu.dot_dimension_numbers<[1], [0], [0], [1], [0, 0, 1, 1], [], []>} : vector<8x32xf32>, vector<32x32xf32>, vector<8x32xf32> -> vector<8x32xf32>
    %69 = arith.addf %67, %68 : vector<8x32xf32>
    %cst_46 = arith.constant 0.000000e+00 : f32
    %70 = vector.broadcast %cst_46 : f32 to vector<8x32xf32>
    %71 = arith.maximumf %69, %70 : vector<8x32xf32>
    %cst_47 = arith.constant dense<0.000000e+00> : vector<8x32xf32>
    %72 = tpu.matmul %71, %1, %cst_47 {dimension_numbers = #tpu.dot_dimension_numbers<[1], [0], [0], [1], [0, 0, 1, 1], [], []>} : vector<8x32xf32>, vector<32x32xf32>, vector<8x32xf32> -> vector<8x32xf32>
    %73 = vector.broadcast %5 : vector<1x32xf32> to vector<8x32xf32>
    %74 = arith.addf %72, %73 : vector<8x32xf32>
    %cst_48 = arith.constant dense<0.000000e+00> : vector<8x32xf32>
    %75 = tpu.matmul %66, %3, %cst_48 {dimension_numbers = #tpu.dot_dimension_numbers<[1], [0], [0], [1], [0, 0, 1, 1], [], []>} : vector<8x32xf32>, vector<32x32xf32>, vector<8x32xf32> -> vector<8x32xf32>
    %76 = arith.addf %74, %75 : vector<8x32xf32>
    %cst_49 = arith.constant 0.000000e+00 : f32
    %77 = vector.broadcast %cst_49 : f32 to vector<8x32xf32>
    %78 = arith.maximumf %76, %77 : vector<8x32xf32>
    %c48 = arith.constant 48 : index
    %c0_50 = arith.constant 0 : index
    %79 = vector.load %arg11[%c48, %c0_50] : memref<64x32xf32, #tpu.memory_space<vmem>>, vector<8x32xf32>
    %cst_51 = arith.constant dense<0.000000e+00> : vector<8x32xf32>
    %80 = tpu.matmul %71, %2, %cst_51 {dimension_numbers = #tpu.dot_dimension_numbers<[1], [0], [0], [1], [0, 0, 1, 1], [], []>} : vector<8x32xf32>, vector<32x32xf32>, vector<8x32xf32> -> vector<8x32xf32>
    %81 = arith.addf %79, %80 : vector<8x32xf32>
    %cst_52 = arith.constant 0.000000e+00 : f32
    %82 = vector.broadcast %cst_52 : f32 to vector<8x32xf32>
    %83 = arith.maximumf %81, %82 : vector<8x32xf32>
    %cst_53 = arith.constant dense<0.000000e+00> : vector<8x32xf32>
    %84 = tpu.matmul %83, %1, %cst_53 {dimension_numbers = #tpu.dot_dimension_numbers<[1], [0], [0], [1], [0, 0, 1, 1], [], []>} : vector<8x32xf32>, vector<32x32xf32>, vector<8x32xf32> -> vector<8x32xf32>
    %85 = vector.broadcast %5 : vector<1x32xf32> to vector<8x32xf32>
    %86 = arith.addf %84, %85 : vector<8x32xf32>
    %cst_54 = arith.constant dense<0.000000e+00> : vector<8x32xf32>
    %87 = tpu.matmul %78, %3, %cst_54 {dimension_numbers = #tpu.dot_dimension_numbers<[1], [0], [0], [1], [0, 0, 1, 1], [], []>} : vector<8x32xf32>, vector<32x32xf32>, vector<8x32xf32> -> vector<8x32xf32>
    %88 = arith.addf %86, %87 : vector<8x32xf32>
    %cst_55 = arith.constant 0.000000e+00 : f32
    %89 = vector.broadcast %cst_55 : f32 to vector<8x32xf32>
    %90 = arith.maximumf %88, %89 : vector<8x32xf32>
    %c56 = arith.constant 56 : index
    %c0_56 = arith.constant 0 : index
    %91 = vector.load %arg11[%c56, %c0_56] : memref<64x32xf32, #tpu.memory_space<vmem>>, vector<8x32xf32>
    %cst_57 = arith.constant dense<0.000000e+00> : vector<8x32xf32>
    %92 = tpu.matmul %83, %2, %cst_57 {dimension_numbers = #tpu.dot_dimension_numbers<[1], [0], [0], [1], [0, 0, 1, 1], [], []>} : vector<8x32xf32>, vector<32x32xf32>, vector<8x32xf32> -> vector<8x32xf32>
    %93 = arith.addf %91, %92 : vector<8x32xf32>
    %cst_58 = arith.constant 0.000000e+00 : f32
    %94 = vector.broadcast %cst_58 : f32 to vector<8x32xf32>
    %95 = arith.maximumf %93, %94 : vector<8x32xf32>
    %cst_59 = arith.constant dense<0.000000e+00> : vector<8x32xf32>
    %96 = tpu.matmul %95, %1, %cst_59 {dimension_numbers = #tpu.dot_dimension_numbers<[1], [0], [0], [1], [0, 0, 1, 1], [], []>} : vector<8x32xf32>, vector<32x32xf32>, vector<8x32xf32> -> vector<8x32xf32>
    %97 = vector.broadcast %5 : vector<1x32xf32> to vector<8x32xf32>
    %98 = arith.addf %96, %97 : vector<8x32xf32>
    %cst_60 = arith.constant dense<0.000000e+00> : vector<8x32xf32>
    %99 = tpu.matmul %90, %3, %cst_60 {dimension_numbers = #tpu.dot_dimension_numbers<[1], [0], [0], [1], [0, 0, 1, 1], [], []>} : vector<8x32xf32>, vector<32x32xf32>, vector<8x32xf32> -> vector<8x32xf32>
    %100 = arith.addf %98, %99 : vector<8x32xf32>
    %cst_61 = arith.constant 0.000000e+00 : f32
    %101 = vector.broadcast %cst_61 : f32 to vector<8x32xf32>
    %102 = arith.maximumf %100, %101 : vector<8x32xf32>
    %c0_62 = arith.constant 0 : index
    %c0_63 = arith.constant 0 : index
    %103 = vector.load %arg8[%c0_62, %c0_63] : memref<32x8xf32, #tpu.memory_space<vmem>>, vector<32x8xf32>
    %cst_64 = arith.constant dense<0.000000e+00> : vector<8x8xf32>
    %104 = tpu.matmul %102, %103, %cst_64 {dimension_numbers = #tpu.dot_dimension_numbers<[1], [0], [0], [1], [0, 0, 1, 1], [], []>} : vector<8x32xf32>, vector<32x8xf32>, vector<8x8xf32> -> vector<8x8xf32>
    %c0_65 = arith.constant 0 : index
    %c0_66 = arith.constant 0 : index
    %105 = vector.load %arg9[%c0_65, %c0_66] : memref<1x8xf32, #tpu.memory_space<vmem>>, vector<1x8xf32>
    %106 = vector.broadcast %105 : vector<1x8xf32> to vector<8x8xf32>
    %107 = arith.addf %104, %106 : vector<8x8xf32>
    %c0_67 = arith.constant 0 : index
    %c0_68 = arith.constant 0 : index
    %108 = vector.load %arg10[%c0_67, %c0_68] : memref<8x8xf32, #tpu.memory_space<vmem>>, vector<8x8xf32>
    tpu.vector_store %arg10[%c0_67, %c0_68], %107 {strides = array<i32>} : memref<8x8xf32, #tpu.memory_space<vmem>>, vector<8x8xf32>,
    return
  }
  func.func @transform_0(%arg0: i32) -> (i32, i32) {
    %c0_i32 = arith.constant 0 : i32
    %c0_i32_0 = arith.constant 0 : i32
    %c0_i32_1 = arith.constant 0 : i32
    return %c0_i32, %c0_i32_0 : i32, i32
  }
  func.func @transform_1(%arg0: i32) -> (i32, i32) {
    %c0_i32 = arith.constant 0 : i32
    %c0_i32_0 = arith.constant 0 : i32
    %c0_i32_1 = arith.constant 0 : i32
    return %c0_i32, %c0_i32_0 : i32, i32
  }
  func.func @transform_2(%arg0: i32) -> (i32, i32) {
    %c0_i32 = arith.constant 0 : i32
    %c0_i32_0 = arith.constant 0 : i32
    %c0_i32_1 = arith.constant 0 : i32
    return %c0_i32, %c0_i32_0 : i32, i32
  }
  func.func @transform_3(%arg0: i32) -> (i32, i32) {
    %c0_i32 = arith.constant 0 : i32
    %c0_i32_0 = arith.constant 0 : i32
    %c0_i32_1 = arith.constant 0 : i32
    return %c0_i32, %c0_i32_0 : i32, i32
  }
  func.func @transform_4(%arg0: i32) -> (i32, i32) {
    %c0_i32 = arith.constant 0 : i32
    %c0_i32_0 = arith.constant 0 : i32
    %c0_i32_1 = arith.constant 0 : i32
    return %c0_i32, %c0_i32_0 : i32, i32
  }
  func.func @transform_5(%arg0: i32) -> (i32, i32) {
    %c0_i32 = arith.constant 0 : i32
    %c0_i32_0 = arith.constant 0 : i32
    %c0_i32_1 = arith.constant 0 : i32
    return %c0_i32, %c0_i32_0 : i32, i32
  }
  func.func @transform_6(%arg0: i32) -> (i32, i32) {
    %c0_i32 = arith.constant 0 : i32
    %c0_i32_0 = arith.constant 0 : i32
    %c0_i32_1 = arith.constant 0 : i32
    return %c0_i32, %c0_i32_0 : i32, i32
  }
  func.func @transform_7(%arg0: i32) -> (i32, i32) {
    %c0_i32 = arith.constant 0 : i32
    %c0_i32_0 = arith.constant 0 : i32
    %c0_i32_1 = arith.constant 0 : i32
    return %c0_i32, %c0_i32_0 : i32, i32
  }
  func.func @transform_8(%arg0: i32) -> (i32, i32) {
    %c0_i32 = arith.constant 0 : i32
    %c0_i32_0 = arith.constant 0 : i32
    %c0_i32_1 = arith.constant 0 : i32
    return %c0_i32, %c0_i32_0 : i32, i32
  }
  func.func @transform_9(%arg0: i32) -> (i32, i32) {
    %c0_i32 = arith.constant 0 : i32
    %c0_i32_0 = arith.constant 0 : i32
    %c0_i32_1 = arith.constant 0 : i32
    return %c0_i32, %c0_i32_0 : i32, i32
  }
}

</mosaic_0001>

<bundles_post_ra>
// kernel: tpu_custom_call.1
= control target key start
LH: loop header
LB: loop body
LE: loop exit
PB: predicated region body
PF: predicated region fallthrough
CT: control target
= control target key end

     0   :  { %vm63_vm0 = vcmask 130048   ;;  %s2836_s0 = inlined_call_operand.vmem [shape: f32[64,16], index: 0, kind: input, shape index: {}]   ;;  %s2837_s1 = inlined_call_operand.vmem [shape: f32[16,32], index: 1, kind: input, shape index: {}]   ;;  %s2838_s2 = inlined_call_operand.vmem [shape: f32[32,32], index: 2, kind: input, shape index: {}]   ;;  %s2839_s3 = inlined_call_operand.vmem [shape: f32[1,32], index: 3, kind: input, shape index: {}]   ;;  %s2840_s4 = inlined_call_operand.vmem [shape: f32[32,32], index: 4, kind: input, shape index: {}]   ;;  %s2841_s5 = inlined_call_operand.vmem [shape: f32[32,32], index: 5, kind: input, shape index: {}]   ;;  %s2842_s6 = inlined_call_operand.vmem [shape: f32[1,32], index: 6, kind: input, shape index: {}]   ;;  %s2843_s7 = inlined_call_operand.vmem [shape: f32[32,8], index: 7, kind: input, shape index: {}]   ;;  %s2844_s8 = inlined_call_operand.vmem [shape: f32[1,8], index: 8, kind: input, shape index: {}]   ;;  %s2845_s9 = inlined_call_operand.hbm [shape: f32[8,8], index: 9, kind: output, shape index: {}]  }
   0x1   :  { %v34_v0 = vld [vmem:[%s2837_s1 + $0x8] sm:$0xff]  ;;  %v33_v1 = vld [vmem:[%s2837_s1] sm:$0xff] }
   0x2   :  { %v49_v2 = vld [vmem:[%s2836_s0] sm:$0xff]  ;;  %2090 = vmatprep.subr.mxu0 %v34_v0 }
   0x3   :  { %2094 = vmatprep.mubr.msk.f32.mxu0 %vm63_vm0, %v49_v2 }
   0x4   :  { %14 = vsyncpa [#allocation4], 0  ;;  %2091 = vmatpush3.msra.mxu0 %v34_v0  ;;  %v50_v3 = vld [vmem:[%s2836_s0 + $0x8] sm:$0xff]  ;;  %v2454_v4 = vld [vmem:[%s2840_s4 + $0x18] sm:$0xff]  ;;  %v2384_v5 = vmov 0.0   ;;  %vm2385_vm1 = vmmov 0  }
   0x5   :  { %2092 = vmatprep.subr.mxu0 %v33_v1  ;;  %2106 = vmatprep.subr.mxu1 %v2384_v5  ;;  %v2460_v6 = vld [vmem:[%s2840_s4 + $0x10] sm:$0xff]  ;;  %v2470_v7 = vld [vmem:[%s2840_s4 + $0x8] sm:$0xff]  ;;  %v2479_v8 = vld [vmem:[%s2840_s4] sm:$0xff]  ;;  %vm193_vm2 = vcmask 261120   ;;  %s2386_s15 = smov [#allocation3]   ;;  %vm1915_vm3 = vcmask 64512  }
   0x6   :  { %2093 = vmatpush3.msra.mxu0 %v33_v1  ;;  %2114 = vmatprep.mubr.msk.f32.mxu1 %vm2385_vm1, %v2384_v5  ;;  %v51_v9 = vld [vmem:[%s2836_s0 + $0x10] sm:$0xff]  ;;  %v52_v10 = vld [vmem:[%s2836_s0 + $0x18] sm:$0xff]  ;;  %v2502_v11 = vld [vmem:[%s2839_s3] ss:$0 sm:$0xff]  ;;  %s1923_s16 = sshll.u32 %s2386_s15, 4  ;;  %s1924_s16 = int_to_ptr.vmem [resolvable:$true] %s1923_s16 }
   0x7   :  { %2095 = vmatmul.mubr.msk.f32.vlgmr.msra.gmra.mxu0 %vm63_vm0, %v50_v3  ;;  %2107 = vmatpush3.msra.mxu1 %v2454_v4  ;;  %v2511_v18 = vld [vmem:[%s2838_s2 + $0x18] sm:$0xff]  ;;  %v2517_v19 = vld [vmem:[%s2838_s2 + $0x10] sm:$0xff]  ;;  %v2526_v20 = vld [vmem:[%s2838_s2 + $0x8] sm:$0xff]  ;;  %p2367_p1 = scmp.lt.s32.totalorder %s1924_s16, %s1924_s16 }
   0x8   :  { %2128 = vmatprep.subr.mxu0 %v2384_v5  ;;  %2108 = vmatprep.subr.mxu1 %v2384_v5  ;;  %v2533_v21 = vld [vmem:[%s2838_s2] sm:$0xff]  ;;  %v2540_v22 = vld [vmem:[%s2841_s5 + $0x18] sm:$0xff]  ;;  %v2552_v23 = vld [vmem:[%s2841_s5 + $0x10] sm:$0xff] }
   0x9   :  { %2129 = vmatpush3.msra.mxu0 %v2454_v4  ;;  %2109 = vmatpush3.msra.mxu1 %v2460_v6  ;;  %v53_v24 = vld [vmem:[%s2836_s0 + $0x20] sm:$0xff]  ;;  %v54_v25 = vld [vmem:[%s2836_s0 + $0x28] sm:$0xff]  ;;  %v55_v28 = vld [vmem:[%s2836_s0 + $0x30] sm:$0xff] }
   0xa   :  { %2130 = vmatprep.subr.mxu0 %v2384_v5  ;;  %2110 = vmatprep.subr.mxu1 %v2384_v5  ;;  %v2566_v26 = vld [vmem:[%s2841_s5 + $0x8] sm:$0xff]  ;;  %v2573_v27 = vld [vmem:[%s2841_s5] sm:$0xff]  ;;  %v56_v29 = vld [vmem:[%s2836_s0 + $0x38] sm:$0xff] }
   0xb   :  { %2131 = vmatpush3.msra.mxu0 %v2460_v6  ;;  %2111 = vmatpush3.msra.mxu1 %v2470_v7  ;;  %v2595_v34 = vld [vmem:[%s2842_s6] ss:$0 sm:$0xff] }
   0xc   :  { %2132 = vmatprep.subr.mxu0 %v2384_v5  ;;  %2112 = vmatprep.subr.mxu1 %v2384_v5 }
   0xd   :  { %2133 = vmatpush3.msra.mxu0 %v2470_v7  ;;  %2113 = vmatpush3.msra.mxu1 %v2479_v8 }
   0xe   :  { %2134 = vmatprep.subr.mxu0 %v2384_v5  ;;  %2117 = vmatprep.subr.mxu1 %v2384_v5 }
   0xf   :  { %2135 = vmatpush3.msra.mxu0 %v2479_v8  ;;  %2097 = vmatprep.mubr.msk.f32.mxu0 %vm63_vm0, %v51_v9 }
  0x10   :  { %2150 = vmatprep.subr.mxu0 %v2384_v5  ;;  %2098 = vmatmul.mubr.msk.f32.gmra.mxu0 %vm63_vm0, %v52_v10 }
  0x11   :  { %2100 = vmatprep.mubr.msk.f32.mxu0 %vm63_vm0, %v53_v24 }
  0x14   :  { %2101 = vmatmul.mubr.msk.f32.gmra.mxu0 %vm63_vm0, %v54_v25 }
  0x15   :  { %2103 = vmatprep.mubr.msk.f32.mxu0 %vm63_vm0, %v55_v28 }
  0x18   :  { %2104 = vmatmul.mubr.msk.f32.gmra.mxu0 %vm63_vm0, %v56_v29 }
  0x19   :  { %2136 = vmatprep.mubr.msk.f32.mxu0 %vm2385_vm1, %v2384_v5 }
  0xc7   :  { %v2096_v12 = vpop.f32.mrf.mxu0 }
  0xc8   :  { %v160_v13 = vadd.f32 %v2096_v12, %v2502_v11 }
  0xc9   :  { %v154_v14 = vpop.f32.mrf.mxu0 }
  0xca   :  { %195 = vst.msk [vmem:[#allocation2 + $0x8] sm:$0xff] %vm193_vm2, %v160_v13  ;;  %v155_v15 = vadd.f32 %v2502_v11, %v154_v14 }
  0xcc   :  { %194 = vst.msk [vmem:[#allocation2] sm:$0xff] %vm193_vm2, %v155_v15 }
  0xd0   :  { %v2099_v30 = vpop.f32.mrf.mxu0 }
  0xd1   :  { %v170_v31 = vadd.f32 %v2099_v30, %v2502_v11  ;;  %v284_v39 = vld [vmem:[#allocation2 + $0x8] sm:$0xff] }
  0xd2   :  { %v164_v32 = vpop.f32.mrf.mxu0 }
  0xd3   :  { %v202_v16 = vld [vmem:[#allocation2] sm:$0xff]  ;;  %197 = vst.msk [vmem:[#allocation2 + $0x18] sm:$0xff] %vm193_vm2, %v170_v31  ;;  %v165_v33 = vadd.f32 %v2502_v11, %v164_v32 }
  0xd4   :  { %v203_v17 = vmax.f32 %v202_v16, 0.0  ;;  %v2102_v44 = vpop.f32.mrf.mxu0 }
  0xd5   :  { %196 = vst.msk [vmem:[#allocation2 + $0x10] sm:$0xff] %vm193_vm2, %v165_v33  ;;  %v180_v45 = vadd.f32 %v2102_v44, %v2502_v11 }
  0xd6   :  { %2115 = vmatmul.mubr.msk.f32.vlgmr.msra.gmra.mxu1 %vm193_vm2, %v203_v17  ;;  %v174_v46 = vpop.f32.mrf.mxu0 }
  0xd7   :  { %2118 = vmatpush3.msra.mxu1 %v2511_v18  ;;  %2125 = vmatprep.mubr.msk.f32.mxu1 %vm2385_vm1, %v2384_v5  ;;  %199 = vst.msk [vmem:[#allocation2 + $0x28] sm:$0xff] %vm193_vm2, %v180_v45  ;;  %v175_v47 = vadd.f32 %v2502_v11, %v174_v46 }
  0xd8   :  { %2119 = vmatprep.subr.mxu1 %v2384_v5  ;;  %v2105_v48 = vpop.f32.mrf.mxu0 }
  0xd9   :  { %2120 = vmatpush3.msra.mxu1 %v2517_v19  ;;  %198 = vst.msk [vmem:[#allocation2 + $0x20] sm:$0xff] %vm193_vm2, %v175_v47  ;;  %v190_v49 = vadd.f32 %v2105_v48, %v2502_v11 }
  0xda   :  { %2121 = vmatprep.subr.mxu1 %v2384_v5  ;;  %v184_v50 = vpop.f32.mrf.mxu0  ;;  %v726_v12 = vld [vmem:[#allocation2 + $0x18] sm:$0xff] }
  0xdb   :  { %2122 = vmatpush3.msra.mxu1 %v2526_v20  ;;  %201 = vst.msk [vmem:[#allocation2 + $0x38] sm:$0xff] %vm193_vm2, %v190_v49  ;;  %v185_v51 = vadd.f32 %v2502_v11, %v184_v50 }
  0xdc   :  { %2123 = vmatprep.subr.mxu1 %v2384_v5  ;;  %v505_v59 = vld [vmem:[#allocation2 + $0x10] sm:$0xff] }
  0xdd   :  { %2124 = vmatpush3.msra.mxu1 %v2533_v21  ;;  %200 = vst.msk [vmem:[#allocation2 + $0x30] sm:$0xff] %vm193_vm2, %v185_v51 }
  0xde   :  { %2126 = vmatmul.mubr.msk.f32.vlgmr.msra.gmra.mxu1 %vm193_vm2, %v203_v17  ;;  %2139 = vmatprep.subr.mxu1 %v2384_v5  ;;  %v1168_v45 = vld [vmem:[#allocation2 + $0x28] sm:$0xff] }
  0xdf   :  { %2140 = vmatpush3.msra.mxu1 %v2540_v22  ;;  %2147 = vmatprep.mubr.msk.f32.mxu1 %vm2385_vm1, %v2384_v5 }
  0xe0   :  { %2141 = vmatprep.subr.mxu1 %v2384_v5  ;;  %v947_v32 = vld [vmem:[#allocation2 + $0x20] sm:$0xff] }
  0xe1   :  { %2142 = vmatpush3.msra.mxu1 %v2552_v23 }
  0xe2   :  { %2143 = vmatprep.subr.mxu1 %v2384_v5 }
  0xe3   :  { %2144 = vmatpush3.msra.mxu1 %v2566_v26 }
  0xe4   :  { %2145 = vmatprep.subr.mxu1 %v2384_v5 }
  0xe5   :  { %2146 = vmatpush3.msra.mxu1 %v2573_v27 }
  0xe6   :  { %2161 = vmatprep.subr.mxu1 %v2384_v5 }
 0x196   :  { %v279_v35 = vpop.f32.mrf.mxu1 }
 0x197   :  { %v280_v36 = vadd.f32 %v2595_v34, %v279_v35 }
 0x198   :  { %v2116_v37 = vpop.f32.mrf.mxu1 }
 0x199   :  { %v283_v38 = vmax.f32 %v280_v36, 0.0 }
 0x19b   :  { %2148 = vmatmul.mubr.msk.f32.vlgmr.msra.gmra.mxu1 %vm193_vm2, %v283_v38 }
 0x19c   :  { %2162 = vmatpush3.msra.mxu1 %v2454_v4  ;;  %2169 = vmatprep.mubr.msk.f32.mxu1 %vm2385_vm1, %v2384_v5 }
 0x19d   :  { %2163 = vmatprep.subr.mxu1 %v2384_v5 }
 0x19e   :  { %v351_v40 = vpop.f32.mrf.mxu1  ;;  %2164 = vmatpush3.msra.mxu1 %v2460_v6 }
 0x19f   :  { %v355_v41 = vadd.f32 %v351_v40, %v284_v39  ;;  %2165 = vmatprep.subr.mxu1 %v2384_v5 }
 0x1a0   :  { %v2127_v42 = vpop.f32.mrf.mxu1  ;;  %2166 = vmatpush3.msra.mxu1 %v2470_v7 }
 0x1a1   :  { %v356_v43 = vmax.f32 %v355_v41, 0.0  ;;  %2167 = vmatprep.subr.mxu1 %v2384_v5 }
 0x1a2   :  { %2168 = vmatpush3.msra.mxu1 %v2479_v8 }
 0x1a3   :  { %2137 = vmatmul.mubr.msk.f32.vlgmr.msra.gmra.mxu0 %vm193_vm2, %v356_v43  ;;  %2183 = vmatprep.subr.mxu1 %v2384_v5 }
 0x1a4   :  { %2151 = vmatpush3.msra.mxu0 %v2511_v18  ;;  %2158 = vmatprep.mubr.msk.f32.mxu0 %vm2385_vm1, %v2384_v5 }
 0x1a5   :  { %2152 = vmatprep.subr.mxu0 %v2384_v5 }
 0x1a6   :  { %2153 = vmatpush3.msra.mxu0 %v2517_v19 }
 0x1a7   :  { %2154 = vmatprep.subr.mxu0 %v2384_v5 }
 0x1a8   :  { %2155 = vmatpush3.msra.mxu0 %v2526_v20 }
 0x1a9   :  { %2156 = vmatprep.subr.mxu0 %v2384_v5 }
 0x1aa   :  { %2157 = vmatpush3.msra.mxu0 %v2533_v21 }
 0x1ab   :  { %2159 = vmatmul.mubr.msk.f32.vlgmr.msra.gmra.mxu0 %vm193_vm2, %v356_v43  ;;  %2172 = vmatprep.subr.mxu0 %v2384_v5 }
 0x1ac   :  { %2173 = vmatpush3.msra.mxu0 %v2540_v22  ;;  %2180 = vmatprep.mubr.msk.f32.mxu0 %vm2385_vm1, %v2384_v5 }
 0x1ad   :  { %2174 = vmatprep.subr.mxu0 %v2384_v5 }
 0x1ae   :  { %2175 = vmatpush3.msra.mxu0 %v2552_v23 }
 0x1af   :  { %2176 = vmatprep.subr.mxu0 %v2384_v5 }
 0x1b0   :  { %2177 = vmatpush3.msra.mxu0 %v2566_v26 }
 0x1b1   :  { %2178 = vmatprep.subr.mxu0 %v2384_v5 }
 0x1b2   :  { %2179 = vmatpush3.msra.mxu0 %v2573_v27 }
 0x1b3   :  { %2194 = vmatprep.subr.mxu0 %v2384_v5 }
 0x25b   :  { %v499_v52 = vpop.f32.mrf.mxu1 }
 0x25d   :  { %v2149_v53 = vpop.f32.mrf.mxu1 }
 0x263   :  { %v426_v54 = vpop.f32.mrf.mxu0 }
 0x264   :  { %v427_v55 = vadd.f32 %v2595_v34, %v426_v54 }
 0x265   :  { %v2138_v56 = vpop.f32.mrf.mxu0 }
 0x266   :  { %v503_v57 = vadd.f32 %v499_v52, %v427_v55 }
 0x268   :  { %v504_v58 = vmax.f32 %v503_v57, 0.0  ;;  %v1389_v57 = vld [vmem:[#allocation2 + $0x30] sm:$0xff] }
 0x26a   :  { %2181 = vmatmul.mubr.msk.f32.vlgmr.msra.gmra.mxu0 %vm193_vm2, %v504_v58 }
 0x26b   :  { %v572_v60 = vpop.f32.mrf.mxu0  ;;  %2195 = vmatpush3.msra.mxu0 %v2454_v4  ;;  %2202 = vmatprep.mubr.msk.f32.mxu0 %vm2385_vm1, %v2384_v5 }
 0x26c   :  { %v576_v61 = vadd.f32 %v572_v60, %v505_v59  ;;  %2196 = vmatprep.subr.mxu0 %v2384_v5 }
 0x26d   :  { %v2160_v62 = vpop.f32.mrf.mxu0  ;;  %2197 = vmatpush3.msra.mxu0 %v2460_v6 }
 0x26e   :  { %v577_v63 = vmax.f32 %v576_v61, 0.0  ;;  %2198 = vmatprep.subr.mxu0 %v2384_v5 }
 0x26f   :  { %2199 = vmatpush3.msra.mxu0 %v2470_v7 }
 0x270   :  { %2170 = vmatmul.mubr.msk.f32.vlgmr.msra.gmra.mxu1 %vm193_vm2, %v577_v63  ;;  %2200 = vmatprep.subr.mxu0 %v2384_v5 }
 0x271   :  { %2184 = vmatpush3.msra.mxu1 %v2511_v18  ;;  %2191 = vmatprep.mubr.msk.f32.mxu1 %vm2385_vm1, %v2384_v5 }
 0x272   :  { %2185 = vmatprep.subr.mxu1 %v2384_v5  ;;  %2201 = vmatpush3.msra.mxu0 %v2479_v8 }
 0x273   :  { %2186 = vmatpush3.msra.mxu1 %v2517_v19  ;;  %2216 = vmatprep.subr.mxu0 %v2384_v5 }
 0x274   :  { %2187 = vmatprep.subr.mxu1 %v2384_v5 }
 0x275   :  { %2188 = vmatpush3.msra.mxu1 %v2526_v20 }
 0x276   :  { %2189 = vmatprep.subr.mxu1 %v2384_v5 }
 0x277   :  { %2190 = vmatpush3.msra.mxu1 %v2533_v21 }
 0x278   :  { %2192 = vmatmul.mubr.msk.f32.vlgmr.msra.gmra.mxu1 %vm193_vm2, %v577_v63  ;;  %2205 = vmatprep.subr.mxu1 %v2384_v5 }
 0x279   :  { %2206 = vmatpush3.msra.mxu1 %v2540_v22  ;;  %2213 = vmatprep.mubr.msk.f32.mxu1 %vm2385_vm1, %v2384_v5 }
 0x27a   :  { %2207 = vmatprep.subr.mxu1 %v2384_v5 }
 0x27b   :  { %2208 = vmatpush3.msra.mxu1 %v2552_v23 }
 0x27c   :  { %2209 = vmatprep.subr.mxu1 %v2384_v5 }
 0x27d   :  { %2210 = vmatpush3.msra.mxu1 %v2566_v26 }
 0x27e   :  { %2211 = vmatprep.subr.mxu1 %v2384_v5 }
 0x27f   :  { %2212 = vmatpush3.msra.mxu1 %v2573_v27 }
 0x280   :  { %2227 = vmatprep.subr.mxu1 %v2384_v5 }
 0x32a   :  { %v720_v0 = vpop.f32.mrf.mxu0 }
 0x32c   :  { %v2182_v1 = vpop.f32.mrf.mxu0 }
 0x32d   :  { %v1831_v1 = vld [vmem:[%s2843_s7] sm:$0xff] }
 0x330   :  { %v647_v2 = vpop.f32.mrf.mxu1 }
 0x331   :  { %v648_v3 = vadd.f32 %v2595_v34, %v647_v2 }
 0x332   :  { %v2171_v9 = vpop.f32.mrf.mxu1 }
 0x333   :  { %v724_v10 = vadd.f32 %v720_v0, %v648_v3  ;;  %v1832_v0 = vld [vmem:[%s2843_s7 + $0x8] sm:$0xff] }
 0x335   :  { %v725_v11 = vmax.f32 %v724_v10, 0.0 }
 0x337   :  { %2214 = vmatmul.mubr.msk.f32.vlgmr.msra.gmra.mxu1 %vm193_vm2, %v725_v11 }
 0x338   :  { %v793_v13 = vpop.f32.mrf.mxu1  ;;  %2228 = vmatpush3.msra.mxu1 %v2454_v4  ;;  %2235 = vmatprep.mubr.msk.f32.mxu1 %vm2385_vm1, %v2384_v5 }
 0x339   :  { %v797_v14 = vadd.f32 %v793_v13, %v726_v12  ;;  %2229 = vmatprep.subr.mxu1 %v2384_v5 }
 0x33a   :  { %v2193_v15 = vpop.f32.mrf.mxu1  ;;  %2230 = vmatpush3.msra.mxu1 %v2460_v6 }
 0x33b   :  { %v798_v16 = vmax.f32 %v797_v14, 0.0  ;;  %2231 = vmatprep.subr.mxu1 %v2384_v5  ;;  %v1963_v14 = vld [vmem:[%s2844_s8] ss:$0 sm:$0xff] }
 0x33c   :  { %2232 = vmatpush3.msra.mxu1 %v2470_v7 }
 0x33d   :  { %2203 = vmatmul.mubr.msk.f32.vlgmr.msra.gmra.mxu0 %vm193_vm2, %v798_v16  ;;  %2233 = vmatprep.subr.mxu1 %v2384_v5 }
 0x33e   :  { %2217 = vmatpush3.msra.mxu0 %v2511_v18  ;;  %2224 = vmatprep.mubr.msk.f32.mxu0 %vm2385_vm1, %v2384_v5 }
 0x33f   :  { %2218 = vmatprep.subr.mxu0 %v2384_v5  ;;  %2234 = vmatpush3.msra.mxu1 %v2479_v8 }
 0x340   :  { %2219 = vmatpush3.msra.mxu0 %v2517_v19  ;;  %2249 = vmatprep.subr.mxu1 %v2384_v5 }
 0x341   :  { %2220 = vmatprep.subr.mxu0 %v2384_v5 }
 0x342   :  { %2221 = vmatpush3.msra.mxu0 %v2526_v20 }
 0x343   :  { %2222 = vmatprep.subr.mxu0 %v2384_v5 }
 0x344   :  { %2223 = vmatpush3.msra.mxu0 %v2533_v21 }
 0x345   :  { %2225 = vmatmul.mubr.msk.f32.vlgmr.msra.gmra.mxu0 %vm193_vm2, %v798_v16  ;;  %2238 = vmatprep.subr.mxu0 %v2384_v5 }
 0x346   :  { %2239 = vmatpush3.msra.mxu0 %v2540_v22  ;;  %2246 = vmatprep.mubr.msk.f32.mxu0 %vm2385_vm1, %v2384_v5 }
 0x347   :  { %2240 = vmatprep.subr.mxu0 %v2384_v5 }
 0x348   :  { %2241 = vmatpush3.msra.mxu0 %v2552_v23 }
 0x349   :  { %2242 = vmatprep.subr.mxu0 %v2384_v5 }
 0x34a   :  { %2243 = vmatpush3.msra.mxu0 %v2566_v26 }
 0x34b   :  { %2244 = vmatprep.subr.mxu0 %v2384_v5 }
 0x34c   :  { %2245 = vmatpush3.msra.mxu0 %v2573_v27 }
 0x34d   :  { %2260 = vmatprep.subr.mxu0 %v2384_v5 }
 0x3f7   :  { %v941_v17 = vpop.f32.mrf.mxu1 }
 0x3f9   :  { %v2215_v24 = vpop.f32.mrf.mxu1 }
 0x3fd   :  { %v868_v25 = vpop.f32.mrf.mxu0 }
 0x3fe   :  { %v869_v28 = vadd.f32 %v2595_v34, %v868_v25 }
 0x3ff   :  { %v2204_v29 = vpop.f32.mrf.mxu0 }
 0x400   :  { %v945_v30 = vadd.f32 %v941_v17, %v869_v28 }
 0x402   :  { %v946_v31 = vmax.f32 %v945_v30, 0.0 }
 0x404   :  { %2247 = vmatmul.mubr.msk.f32.vlgmr.msra.gmra.mxu0 %vm193_vm2, %v946_v31 }
 0x405   :  { %v1014_v33 = vpop.f32.mrf.mxu0  ;;  %2261 = vmatpush3.msra.mxu0 %v2454_v4  ;;  %2268 = vmatprep.mubr.msk.f32.mxu0 %vm2385_vm1, %v2384_v5 }
 0x406   :  { %v1018_v35 = vadd.f32 %v1014_v33, %v947_v32  ;;  %2262 = vmatprep.subr.mxu0 %v2384_v5 }
 0x407   :  { %v2226_v36 = vpop.f32.mrf.mxu0  ;;  %2263 = vmatpush3.msra.mxu0 %v2460_v6 }
 0x408   :  { %v1019_v37 = vmax.f32 %v1018_v35, 0.0  ;;  %2264 = vmatprep.subr.mxu0 %v2384_v5 }
 0x409   :  { %2265 = vmatpush3.msra.mxu0 %v2470_v7 }
 0x40a   :  { %2236 = vmatmul.mubr.msk.f32.vlgmr.msra.gmra.mxu1 %vm193_vm2, %v1019_v37  ;;  %2266 = vmatprep.subr.mxu0 %v2384_v5 }
 0x40b   :  { %2250 = vmatpush3.msra.mxu1 %v2511_v18  ;;  %2257 = vmatprep.mubr.msk.f32.mxu1 %vm2385_vm1, %v2384_v5 }
 0x40c   :  { %2251 = vmatprep.subr.mxu1 %v2384_v5  ;;  %2267 = vmatpush3.msra.mxu0 %v2479_v8 }
 0x40d   :  { %2252 = vmatpush3.msra.mxu1 %v2517_v19  ;;  %2282 = vmatprep.subr.mxu0 %v2384_v5 }
 0x40e   :  { %2253 = vmatprep.subr.mxu1 %v2384_v5 }
 0x40f   :  { %2254 = vmatpush3.msra.mxu1 %v2526_v20 }
 0x410   :  { %2255 = vmatprep.subr.mxu1 %v2384_v5 }
 0x411   :  { %2256 = vmatpush3.msra.mxu1 %v2533_v21 }
 0x412   :  { %2258 = vmatmul.mubr.msk.f32.vlgmr.msra.gmra.mxu1 %vm193_vm2, %v1019_v37  ;;  %2271 = vmatprep.subr.mxu1 %v2384_v5 }
 0x413   :  { %2272 = vmatpush3.msra.mxu1 %v2540_v22  ;;  %2279 = vmatprep.mubr.msk.f32.mxu1 %vm2385_vm1, %v2384_v5 }
 0x414   :  { %2273 = vmatprep.subr.mxu1 %v2384_v5 }
 0x415   :  { %2274 = vmatpush3.msra.mxu1 %v2552_v23 }
 0x416   :  { %2275 = vmatprep.subr.mxu1 %v2384_v5 }
 0x417   :  { %2276 = vmatpush3.msra.mxu1 %v2566_v26 }
 0x418   :  { %2277 = vmatprep.subr.mxu1 %v2384_v5 }
 0x419   :  { %2278 = vmatpush3.msra.mxu1 %v2573_v27 }
 0x41a   :  { %2293 = vmatprep.subr.mxu1 %v2384_v5 }
 0x4c4   :  { %v1162_v38 = vpop.f32.mrf.mxu0 }
 0x4c6   :  { %v2248_v39 = vpop.f32.mrf.mxu0 }
 0x4ca   :  { %v1089_v40 = vpop.f32.mrf.mxu1 }
 0x4cb   :  { %v1090_v41 = vadd.f32 %v2595_v34, %v1089_v40 }
 0x4cc   :  { %v2237_v42 = vpop.f32.mrf.mxu1 }
 0x4cd   :  { %v1166_v43 = vadd.f32 %v1162_v38, %v1090_v41 }
 0x4cf   :  { %v1167_v44 = vmax.f32 %v1166_v43, 0.0 }
 0x4d1   :  { %2280 = vmatmul.mubr.msk.f32.vlgmr.msra.gmra.mxu1 %vm193_vm2, %v1167_v44 }
 0x4d2   :  { %v1235_v46 = vpop.f32.mrf.mxu1  ;;  %2294 = vmatpush3.msra.mxu1 %v2454_v4  ;;  %2301 = vmatprep.mubr.msk.f32.mxu1 %vm2385_vm1, %v2384_v5 }
 0x4d3   :  { %v1239_v47 = vadd.f32 %v1235_v46, %v1168_v45  ;;  %2295 = vmatprep.subr.mxu1 %v2384_v5 }
 0x4d4   :  { %v2259_v48 = vpop.f32.mrf.mxu1  ;;  %2296 = vmatpush3.msra.mxu1 %v2460_v6 }
 0x4d5   :  { %v1240_v49 = vmax.f32 %v1239_v47, 0.0  ;;  %2297 = vmatprep.subr.mxu1 %v2384_v5 }
 0x4d6   :  { %2298 = vmatpush3.msra.mxu1 %v2470_v7 }
 0x4d7   :  { %2269 = vmatmul.mubr.msk.f32.vlgmr.msra.gmra.mxu0 %vm193_vm2, %v1240_v49  ;;  %2299 = vmatprep.subr.mxu1 %v2384_v5 }
 0x4d8   :  { %2283 = vmatpush3.msra.mxu0 %v2511_v18  ;;  %2290 = vmatprep.mubr.msk.f32.mxu0 %vm2385_vm1, %v2384_v5 }
 0x4d9   :  { %2284 = vmatprep.subr.mxu0 %v2384_v5  ;;  %2300 = vmatpush3.msra.mxu1 %v2479_v8 }
 0x4da   :  { %2285 = vmatpush3.msra.mxu0 %v2517_v19  ;;  %2315 = vmatprep.subr.mxu1 %v2384_v5 }
 0x4db   :  { %2286 = vmatprep.subr.mxu0 %v2384_v5 }
 0x4dc   :  { %2287 = vmatpush3.msra.mxu0 %v2526_v20 }
 0x4dd   :  { %2288 = vmatprep.subr.mxu0 %v2384_v5 }
 0x4de   :  { %2289 = vmatpush3.msra.mxu0 %v2533_v21 }
 0x4df   :  { %2291 = vmatmul.mubr.msk.f32.vlgmr.msra.gmra.mxu0 %vm193_vm2, %v1240_v49  ;;  %2304 = vmatprep.subr.mxu0 %v2384_v5 }
 0x4e0   :  { %2305 = vmatpush3.msra.mxu0 %v2540_v22  ;;  %2312 = vmatprep.mubr.msk.f32.mxu0 %vm2385_vm1, %v2384_v5 }
 0x4e1   :  { %2306 = vmatprep.subr.mxu0 %v2384_v5 }
 0x4e2   :  { %2307 = vmatpush3.msra.mxu0 %v2552_v23 }
 0x4e3   :  { %2308 = vmatprep.subr.mxu0 %v2384_v5 }
 0x4e4   :  { %2309 = vmatpush3.msra.mxu0 %v2566_v26 }
 0x4e5   :  { %2310 = vmatprep.subr.mxu0 %v2384_v5 }
 0x4e6   :  { %2311 = vmatpush3.msra.mxu0 %v2573_v27 }
 0x4e7   :  { %2326 = vmatprep.subr.mxu0 %v2384_v5 }
 0x591   :  { %v1383_v50 = vpop.f32.mrf.mxu1 }
 0x593   :  { %v2281_v51 = vpop.f32.mrf.mxu1 }
 0x597   :  { %v1310_v52 = vpop.f32.mrf.mxu0 }
 0x598   :  { %v1311_v53 = vadd.f32 %v2595_v34, %v1310_v52 }
 0x599   :  { %v2270_v54 = vpop.f32.mrf.mxu0 }
 0x59a   :  { %v1387_v55 = vadd.f32 %v1383_v50, %v1311_v53 }
 0x59c   :  { %v1388_v56 = vmax.f32 %v1387_v55, 0.0 }
 0x59e   :  { %2313 = vmatmul.mubr.msk.f32.vlgmr.msra.gmra.mxu0 %vm193_vm2, %v1388_v56 }
 0x59f   :  { %v1456_v58 = vpop.f32.mrf.mxu0  ;;  %2327 = vmatpush3.msra.mxu0 %v2454_v4  ;;  %2334 = vmatprep.mubr.msk.f32.mxu0 %vm2385_vm1, %v2384_v5 }
 0x5a0   :  { %v1460_v59 = vadd.f32 %v1456_v58, %v1389_v57  ;;  %2328 = vmatprep.subr.mxu0 %v2384_v5 }
 0x5a1   :  { %v2292_v60 = vpop.f32.mrf.mxu0  ;;  %2329 = vmatpush3.msra.mxu0 %v2460_v6 }
 0x5a2   :  { %v1461_v61 = vmax.f32 %v1460_v59, 0.0  ;;  %2330 = vmatprep.subr.mxu0 %v2384_v5 }
 0x5a3   :  { %2331 = vmatpush3.msra.mxu0 %v2470_v7 }
 0x5a4   :  { %2302 = vmatmul.mubr.msk.f32.vlgmr.msra.gmra.mxu1 %vm193_vm2, %v1461_v61  ;;  %2332 = vmatprep.subr.mxu0 %v2384_v5 }
 0x5a5   :  { %2316 = vmatpush3.msra.mxu1 %v2511_v18  ;;  %2323 = vmatprep.mubr.msk.f32.mxu1 %vm2385_vm1, %v2384_v5 }
 0x5a6   :  { %2317 = vmatprep.subr.mxu1 %v2384_v5  ;;  %2333 = vmatpush3.msra.mxu0 %v2479_v8 }
 0x5a7   :  { %2318 = vmatpush3.msra.mxu1 %v2517_v19  ;;  %2348 = vmatprep.subr.mxu0 %v2384_v5 }
 0x5a8   :  { %2319 = vmatprep.subr.mxu1 %v2384_v5 }
 0x5a9   :  { %2320 = vmatpush3.msra.mxu1 %v2526_v20 }
 0x5aa   :  { %2321 = vmatprep.subr.mxu1 %v2384_v5 }
 0x5ab   :  { %2322 = vmatpush3.msra.mxu1 %v2533_v21  ;;  %v1610_v21 = vld [vmem:[#allocation2 + $0x38] sm:$0xff] }
 0x5ac   :  { %2324 = vmatmul.mubr.msk.f32.vlgmr.msra.gmra.mxu1 %vm193_vm2, %v1461_v61  ;;  %2337 = vmatprep.subr.mxu1 %v2384_v5 }
 0x5ad   :  { %2338 = vmatpush3.msra.mxu1 %v2540_v22  ;;  %2345 = vmatprep.mubr.msk.f32.mxu1 %vm2385_vm1, %v2384_v5 }
 0x5ae   :  { %2339 = vmatprep.subr.mxu1 %v2384_v5 }
 0x5af   :  { %2340 = vmatpush3.msra.mxu1 %v2552_v23 }
 0x5b0   :  { %2341 = vmatprep.subr.mxu1 %v2384_v5 }
 0x5b1   :  { %2342 = vmatpush3.msra.mxu1 %v2566_v26  ;;  %v1834_v26 = vld [vmem:[%s2843_s7 + $0x18] sm:$0xff] }
 0x5b2   :  { %2343 = vmatprep.subr.mxu1 %v2384_v5 }
 0x5b3   :  { %2344 = vmatpush3.msra.mxu1 %v2573_v27  ;;  %v1833_v27 = vld [vmem:[%s2843_s7 + $0x10] sm:$0xff]  ;;  %s2362_s7 = scalar_lea.vmem %s1924_s16, 128 }
 0x5b4   :  { %p2363_p0 = scmp.ne.s32.totalorder %s1924_s16, %s2362_s7  ;;  %p2368_p2 = scmp.lt.s32.totalorder %s2362_s7, %s2362_s7 }
 0x5b6   :  { %p2369_p3 = por %p2368_p2, %p2367_p1 }
 0x5b8   :  { %p2370_p4 = pnand %p2369_p3, %p2363_p0 }
 0x65e   :  { %v1604_v4 = vpop.f32.mrf.mxu0 }
 0x660   :  { %v2314_v6 = vpop.f32.mrf.mxu0 }
 0x664   :  { %v1531_v7 = vpop.f32.mrf.mxu1 }
 0x665   :  { %v1532_v8 = vadd.f32 %v2595_v34, %v1531_v7 }
 0x666   :  { %v2303_v18 = vpop.f32.mrf.mxu1 }
 0x667   :  { %v1608_v19 = vadd.f32 %v1604_v4, %v1532_v8 }
 0x669   :  { %v1609_v20 = vmax.f32 %v1608_v19, 0.0 }
 0x66b   :  { %2346 = vmatmul.mubr.msk.f32.vlgmr.msra.gmra.mxu1 %vm193_vm2, %v1609_v20 }
 0x66c   :  { %v1677_v22 = vpop.f32.mrf.mxu1 }
 0x66d   :  { %v1681_v23 = vadd.f32 %v1677_v22, %v1610_v21 }
 0x66e   :  { %v2325_v62 = vpop.f32.mrf.mxu1 }
 0x66f   :  { %v1682_v63 = vmax.f32 %v1681_v23, 0.0 }
 0x671   :  { %2335 = vmatmul.mubr.msk.f32.vlgmr.msra.gmra.mxu0 %vm193_vm2, %v1682_v63 }
 0x672   :  { %2356 = vmatprep.mubr.msk.f32.mxu0 %vm2385_vm1, %v2384_v5  ;;  %2349 = vmatpush3.msra.mxu0 %v1834_v26 }
 0x673   :  { %2350 = vmatprep.subr.mxu0 %v2384_v5 }
 0x674   :  { %2351 = vmatpush3.msra.mxu0 %v1833_v27 }
 0x675   :  { %2352 = vmatprep.subr.mxu0 %v2384_v5 }
 0x676   :  { %2353 = vmatpush3.msra.mxu0 %v1832_v0 }
 0x677   :  { %2354 = vmatprep.subr.mxu0 %v2384_v5 }
 0x678   :  { %2355 = vmatpush3.msra.mxu0 %v1831_v1 }
 0x72b   :  { %v1825_v2 = vpop.f32.mrf.mxu1 }
 0x72d   :  { %v2347_v3 = vpop.f32.mrf.mxu1 }
 0x731   :  { %v1752_v9 = vpop.f32.mrf.mxu0 }
 0x732   :  { %v1753_v10 = vadd.f32 %v2595_v34, %v1752_v9 }
 0x733   :  { %v2336_v11 = vpop.f32.mrf.mxu0 }
 0x734   :  { %v1829_v12 = vadd.f32 %v1825_v2, %v1753_v10 }
 0x736   :  { %v1830_v13 = vmax.f32 %v1829_v12, 0.0 }
 0x738   :  { %2357 = vmatmul.mubr.msk.f32.vlgmr.msra.gmra.mxu0 %vm193_vm2, %v1830_v13 }
 0x7f8   :  { %v1911_v5 = vpop.f32.mrf.mxu0 }
 0x7f9   :  { %v1912_v15 = vadd.f32 %v1963_v14, %v1911_v5 }
 0x7fa   :  { %v2358_v16 = vpop.f32.mrf.mxu0 }
 0x7fb   :  { %1916 = vst.msk [vmem:[#allocation3] sm:$0xff] %vm1915_vm3, %v1912_v15 }
 0x7fc   :  { %2373 = shalt.err (!%p2370_p4)
}
 0x7fd   :  { %1926 = dma.vmem_to_hbm [thread:$0]  %s1924_s16, 128, %s2845_s9, [#allocation4]  }
 0x7fe   :  { %2382 = dma.done.wait [#allocation4], 128  }
 0x7ff   :  { %2383 = vsyncadd [#allocation4], 4294967168 }
 0x800   :  { %1930 = vsyncpa [#allocation4], 1 }

</bundles_post_ra>
